<compile_context>
chip_gen: v7x
topology: tpu7x:2x2x1
jax: 0.10.0
libtpu: 0.0.40
codegen_flags: <defaults>
</compile_context>

<pallas_src>
import math
import jax
import jax.numpy as jnp
from jax.experimental import pallas as pl
from jax.experimental.pallas import tpu as pltpu


def _round_up(n, m):
    return ((n + m - 1) // m) * m


def policy_mean_kernel(x_ref,
                       w1_ref, b1_ref,
                       w2_ref, b2_ref,
                       w3_ref, b3_ref,
                       w4_ref, b4_ref,
                       mean_ref):
    # Three tanh-MLP layers + linear head; single lane-dense output tile.
    h = jnp.tanh(jnp.dot(x_ref[...], w1_ref[...],
                         preferred_element_type=jnp.float32) + b1_ref[...])
    h = jnp.tanh(jnp.dot(h, w2_ref[...],
                         preferred_element_type=jnp.float32) + b2_ref[...])
    h = jnp.tanh(jnp.dot(h, w3_ref[...],
                         preferred_element_type=jnp.float32) + b3_ref[...])
    mean = jnp.dot(h, w4_ref[...],
                   preferred_element_type=jnp.float32) + b4_ref[...]
    mean_ref[...] = mean.astype(mean_ref.dtype)


def policy_forward(x, params):
    """x: (B, state_dim) float32. params: dict of weights/biases/log_std.

    Returns (action_mean, action_log_std, action_std), each (B, action_dim).
    """
    B, state_dim = x.shape
    action_dim = params["w4"].shape[1]

    # --- Lane-dense / MXU-friendly padding (zeros keep the math exact) -----
    K1 = _round_up(state_dim, 128)          # layer-1 K dim -> full 128 lanes
    A_pad = _round_up(action_dim, 128)      # output lanes  -> unmasked vst

    x_p = jnp.pad(x, ((0, 0), (0, K1 - state_dim)))
    w1_p = jnp.pad(params["w1"], ((0, K1 - state_dim), (0, 0)))
    w4_p = jnp.pad(params["w4"], ((0, 0), (0, A_pad - action_dim)))
    b4_p = jnp.pad(params["b4"], ((0, 0), (0, A_pad - action_dim)))

    # --- Batch tiling: grid over batch, weights VMEM-resident --------------
    B8 = _round_up(B, 8)
    B_tile = min(B8, 512)                   # safe on v7x's 64 MiB VMEM too
    B_padded = _round_up(B8, B_tile)
    if B_padded != B:
        x_p = jnp.pad(x_p, ((0, B_padded - B), (0, 0)))
    grid = (B_padded // B_tile,)

    h1, h2, h3 = params["w2"].shape[0], params["w3"].shape[0], params["w4"].shape[0]

    def batch_spec(cols):
        return pl.BlockSpec((B_tile, cols), lambda b: (b, 0))

    def const_spec(shape):
        return pl.BlockSpec(shape, lambda b: (0, 0))

    in_specs = [
        batch_spec(K1),                       # x
        const_spec((K1, h1)),  const_spec((1, h1)),   # W1, b1
        const_spec((h1, h2)),  const_spec((1, h2)),   # W2, b2
        const_spec((h2, h3)),  const_spec((1, h3)),   # W3, b3
        const_spec((h3, A_pad)), const_spec((1, A_pad)),  # W4, b4
    ]
    out_spec = batch_spec(A_pad)

    mean_padded = pl.pallas_call(
        policy_mean_kernel,
        out_shape=jax.ShapeDtypeStruct((B_padded, A_pad), jnp.float32),
        grid=grid,
        in_specs=in_specs,
        out_specs=out_spec,
        compiler_params=pltpu.CompilerParams(
            dimension_semantics=("parallel",)),
    )(x_p,
      w1_p, params["b1"],
      params["w2"], params["b2"],
      params["w3"], params["b3"],
      w4_p, b4_p)

    action_mean = mean_padded[:B, :action_dim]

    # log_std / std do not depend on x: compute once in the wrapper.
    log_std_row = params["log_std"]                       # (1, action_dim)
    action_log_std = jnp.broadcast_to(log_std_row, (B, action_dim))
    action_std = jnp.broadcast_to(jnp.exp(log_std_row), (B, action_dim))
    return action_mean, action_log_std, action_std


def init_policy_params(key, state_dim, action_dim,
                       hidden_size=(128, 256, 128), log_std=0.0):
    """Deterministic synthetic init mimicking nn.Linear's U(-1/sqrt(fan_in), .)."""
    dims = [state_dim] + list(hidden_size) + [action_dim]
    params = {}
    for i, name in enumerate(["1", "2", "3", "4"]):
        fan_in, fan_out = dims[i], dims[i + 1]
        key, kw, kb = jax.random.split(key, 3)
        bound = 1.0 / math.sqrt(fan_in)
        params[f"w{name}"] = jax.random.uniform(
            kw, (fan_in, fan_out), jnp.float32, -bound, bound)
        params[f"b{name}"] = jax.random.uniform(
            kb, (1, fan_out), jnp.float32, -bound, bound)
    params["log_std"] = jnp.full((1, action_dim), log_std, dtype=jnp.float32)
    return params


def policy_forward_ref(x, params):
    """Pure-JAX reference for correctness checking."""
    h = jnp.tanh(x @ params["w1"] + params["b1"])
    h = jnp.tanh(h @ params["w2"] + params["b2"])
    h = jnp.tanh(h @ params["w3"] + params["b3"])
    mean = h @ params["w4"] + params["b4"]
    log_std = jnp.broadcast_to(params["log_std"], mean.shape)
    return mean, log_std, jnp.exp(log_std)


if __name__ == "__main__":
    key = jax.random.PRNGKey(0)
    batch = 8
    state_dim = 32
    action_dim = 4

    key, kx, kp = jax.random.split(key, 3)
    x = jax.random.normal(kx, (batch, state_dim), dtype=jnp.float32)
    params = init_policy_params(kp, state_dim, action_dim)

    mean, log_std, std = policy_forward(x, params)
    jax.block_until_ready((mean, log_std, std))

    # sanity check against pure-JAX reference
    mean_r, log_std_r, std_r = policy_forward_ref(x, params)
    assert mean.shape == (batch, action_dim)
    assert jnp.allclose(mean, mean_r, atol=1e-5, rtol=1e-5)
    assert jnp.allclose(log_std, log_std_r, atol=1e-6)
    assert jnp.allclose(std, std_r, atol=1e-6)

    print("KERNEL_OK")
</pallas_src>

<mosaic_0001>
module attributes {stable_mosaic.version = 11 : i64} {
  func.func @policy_mean_kernel(%arg0: i32, %arg1: memref<8x128xf32, #tpu.memory_space<vmem>>, %arg2: memref<128x128xf32, #tpu.memory_space<vmem>>, %arg3: memref<1x128xf32, #tpu.memory_space<vmem>>, %arg4: memref<128x256xf32, #tpu.memory_space<vmem>>, %arg5: memref<1x256xf32, #tpu.memory_space<vmem>>, %arg6: memref<256x128xf32, #tpu.memory_space<vmem>>, %arg7: memref<1x128xf32, #tpu.memory_space<vmem>>, %arg8: memref<128x128xf32, #tpu.memory_space<vmem>>, %arg9: memref<1x128xf32, #tpu.memory_space<vmem>>, %arg10: memref<8x128xf32, #tpu.memory_space<vmem>>) attributes {dimension_semantics = [#tpu.dimension_semantics<parallel>], iteration_bounds = array<i64: 1>, scalar_prefetch = 0 : i64, scratch_operands = 0 : i64, tpu.core_type = #tpu.core_type<tc>, window_params = [{transform_indices = @transform_0, window_bounds = array<i64: 8, 128>}, {pipeline_mode = #tpu.pipeline_mode<synchronous>, transform_indices = @transform_1, window_bounds = array<i64: 128, 128>}, {pipeline_mode = #tpu.pipeline_mode<synchronous>, transform_indices = @transform_2, window_bounds = array<i64: 1, 128>}, {pipeline_mode = #tpu.pipeline_mode<synchronous>, transform_indices = @transform_3, window_bounds = array<i64: 128, 256>}, {pipeline_mode = #tpu.pipeline_mode<synchronous>, transform_indices = @transform_4, window_bounds = array<i64: 1, 256>}, {pipeline_mode = #tpu.pipeline_mode<synchronous>, transform_indices = @transform_5, window_bounds = array<i64: 256, 128>}, {pipeline_mode = #tpu.pipeline_mode<synchronous>, transform_indices = @transform_6, window_bounds = array<i64: 1, 128>}, {pipeline_mode = #tpu.pipeline_mode<synchronous>, transform_indices = @transform_7, window_bounds = array<i64: 128, 128>}, {pipeline_mode = #tpu.pipeline_mode<synchronous>, transform_indices = @transform_8, window_bounds = array<i64: 1, 128>}, {transform_indices = @transform_9, window_bounds = array<i64: 8, 128>}]} {
    %c0 = arith.constant 0 : index
    %c0_0 = arith.constant 0 : index
    %0 = vector.load %arg1[%c0, %c0_0] : memref<8x128xf32, #tpu.memory_space<vmem>>, vector<8x128xf32>
    %c0_1 = arith.constant 0 : index
    %c0_2 = arith.constant 0 : index
    %1 = vector.load %arg2[%c0_1, %c0_2] : memref<128x128xf32, #tpu.memory_space<vmem>>, vector<128x128xf32>
    %cst = arith.constant dense<0.000000e+00> : vector<8x128xf32>
    %2 = tpu.matmul %0, %1, %cst {dimension_numbers = #tpu.dot_dimension_numbers<[1], [0], [0], [1], [0, 0, 1, 1], [], []>} : vector<8x128xf32>, vector<128x128xf32>, vector<8x128xf32> -> vector<8x128xf32>
    %c0_3 = arith.constant 0 : index
    %c0_4 = arith.constant 0 : index
    %3 = vector.load %arg3[%c0_3, %c0_4] : memref<1x128xf32, #tpu.memory_space<vmem>>, vector<1x128xf32>
    %4 = vector.broadcast %3 : vector<1x128xf32> to vector<8x128xf32>
    %5 = arith.addf %2, %4 : vector<8x128xf32>
    %6 = math.tanh %5 : vector<8x128xf32>
    %c0_5 = arith.constant 0 : index
    %c0_6 = arith.constant 0 : index
    %7 = vector.load %arg4[%c0_5, %c0_6] : memref<128x256xf32, #tpu.memory_space<vmem>>, vector<128x256xf32>
    %cst_7 = arith.constant dense<0.000000e+00> : vector<8x256xf32>
    %8 = tpu.matmul %6, %7, %cst_7 {dimension_numbers = #tpu.dot_dimension_numbers<[1], [0], [0], [1], [0, 0, 1, 1], [], []>} : vector<8x128xf32>, vector<128x256xf32>, vector<8x256xf32> -> vector<8x256xf32>
    %c0_8 = arith.constant 0 : index
    %c0_9 = arith.constant 0 : index
    %9 = vector.load %arg5[%c0_8, %c0_9] : memref<1x256xf32, #tpu.memory_space<vmem>>, vector<1x256xf32>
    %10 = vector.broadcast %9 : vector<1x256xf32> to vector<8x256xf32>
    %11 = arith.addf %8, %10 : vector<8x256xf32>
    %12 = math.tanh %11 : vector<8x256xf32>
    %c0_10 = arith.constant 0 : index
    %c0_11 = arith.constant 0 : index
    %13 = vector.load %arg6[%c0_10, %c0_11] : memref<256x128xf32, #tpu.memory_space<vmem>>, vector<256x128xf32>
    %cst_12 = arith.constant dense<0.000000e+00> : vector<8x128xf32>
    %14 = tpu.matmul %12, %13, %cst_12 {dimension_numbers = #tpu.dot_dimension_numbers<[1], [0], [0], [1], [0, 0, 1, 1], [], []>} : vector<8x256xf32>, vector<256x128xf32>, vector<8x128xf32> -> vector<8x128xf32>
    %c0_13 = arith.constant 0 : index
    %c0_14 = arith.constant 0 : index
    %15 = vector.load %arg7[%c0_13, %c0_14] : memref<1x128xf32, #tpu.memory_space<vmem>>, vector<1x128xf32>
    %16 = vector.broadcast %15 : vector<1x128xf32> to vector<8x128xf32>
    %17 = arith.addf %14, %16 : vector<8x128xf32>
    %18 = math.tanh %17 : vector<8x128xf32>
    %c0_15 = arith.constant 0 : index
    %c0_16 = arith.constant 0 : index
    %19 = vector.load %arg8[%c0_15, %c0_16] : memref<128x128xf32, #tpu.memory_space<vmem>>, vector<128x128xf32>
    %cst_17 = arith.constant dense<0.000000e+00> : vector<8x128xf32>
    %20 = tpu.matmul %18, %19, %cst_17 {dimension_numbers = #tpu.dot_dimension_numbers<[1], [0], [0], [1], [0, 0, 1, 1], [], []>} : vector<8x128xf32>, vector<128x128xf32>, vector<8x128xf32> -> vector<8x128xf32>
    %c0_18 = arith.constant 0 : index
    %c0_19 = arith.constant 0 : index
    %21 = vector.load %arg9[%c0_18, %c0_19] : memref<1x128xf32, #tpu.memory_space<vmem>>, vector<1x128xf32>
    %22 = vector.broadcast %21 : vector<1x128xf32> to vector<8x128xf32>
    %23 = arith.addf %20, %22 : vector<8x128xf32>
    %c0_20 = arith.constant 0 : index
    %c0_21 = arith.constant 0 : index
    %24 = vector.load %arg10[%c0_20, %c0_21] : memref<8x128xf32, #tpu.memory_space<vmem>>, vector<8x128xf32>
    tpu.vector_store %arg10[%c0_20, %c0_21], %23 {strides = array<i32>} : memref<8x128xf32, #tpu.memory_space<vmem>>, vector<8x128xf32>,
    return
  }
  func.func @transform_0(%arg0: i32) -> (i32, i32) {
    %c0_i32 = arith.constant 0 : i32
    %c0_i32_0 = arith.constant 0 : i32
    return %arg0, %c0_i32 : i32, i32
  }
  func.func @transform_1(%arg0: i32) -> (i32, i32) {
    %c0_i32 = arith.constant 0 : i32
    %c0_i32_0 = arith.constant 0 : i32
    %c0_i32_1 = arith.constant 0 : i32
    return %c0_i32, %c0_i32_0 : i32, i32
  }
  func.func @transform_2(%arg0: i32) -> (i32, i32) {
    %c0_i32 = arith.constant 0 : i32
    %c0_i32_0 = arith.constant 0 : i32
    %c0_i32_1 = arith.constant 0 : i32
    return %c0_i32, %c0_i32_0 : i32, i32
  }
  func.func @transform_3(%arg0: i32) -> (i32, i32) {
    %c0_i32 = arith.constant 0 : i32
    %c0_i32_0 = arith.constant 0 : i32
    %c0_i32_1 = arith.constant 0 : i32
    return %c0_i32, %c0_i32_0 : i32, i32
  }
  func.func @transform_4(%arg0: i32) -> (i32, i32) {
    %c0_i32 = arith.constant 0 : i32
    %c0_i32_0 = arith.constant 0 : i32
    %c0_i32_1 = arith.constant 0 : i32
    return %c0_i32, %c0_i32_0 : i32, i32
  }
  func.func @transform_5(%arg0: i32) -> (i32, i32) {
    %c0_i32 = arith.constant 0 : i32
    %c0_i32_0 = arith.constant 0 : i32
    %c0_i32_1 = arith.constant 0 : i32
    return %c0_i32, %c0_i32_0 : i32, i32
  }
  func.func @transform_6(%arg0: i32) -> (i32, i32) {
    %c0_i32 = arith.constant 0 : i32
    %c0_i32_0 = arith.constant 0 : i32
    %c0_i32_1 = arith.constant 0 : i32
    return %c0_i32, %c0_i32_0 : i32, i32
  }
  func.func @transform_7(%arg0: i32) -> (i32, i32) {
    %c0_i32 = arith.constant 0 : i32
    %c0_i32_0 = arith.constant 0 : i32
    %c0_i32_1 = arith.constant 0 : i32
    return %c0_i32, %c0_i32_0 : i32, i32
  }
  func.func @transform_8(%arg0: i32) -> (i32, i32) {
    %c0_i32 = arith.constant 0 : i32
    %c0_i32_0 = arith.constant 0 : i32
    %c0_i32_1 = arith.constant 0 : i32
    return %c0_i32, %c0_i32_0 : i32, i32
  }
  func.func @transform_9(%arg0: i32) -> (i32, i32) {
    %c0_i32 = arith.constant 0 : i32
    %c0_i32_0 = arith.constant 0 : i32
    return %arg0, %c0_i32 : i32, i32
  }
}

</mosaic_0001>

<bundles_post_ra>
// kernel: tpu_custom_call.1
= control target key start
LH: loop header
LB: loop body
LE: loop exit
PB: predicated region body
PF: predicated region fallthrough
CT: control target
= control target key end

     0   :  { %14 = vsyncpa [#allocation3], 0  ;;  %s1124_s0 = inlined_call_operand.hbm [shape: f32[8,128], index: 0, kind: input, shape index: {}]   ;;  %s1125_s1 = inlined_call_operand.hbm [shape: f32[128,128], index: 1, kind: input, shape index: {}]   ;;  %s1126_s2 = inlined_call_operand.vmem [shape: f32[1,128], index: 2, kind: input, shape index: {}]   ;;  %s1127_s3 = inlined_call_operand.hbm [shape: f32[128,256], index: 3, kind: input, shape index: {}]   ;;  %s1128_s4 = inlined_call_operand.vmem [shape: f32[1,256], index: 4, kind: input, shape index: {}]   ;;  %s1129_s5 = inlined_call_operand.hbm [shape: f32[256,128], index: 5, kind: input, shape index: {}]   ;;  %s1130_s6 = inlined_call_operand.vmem [shape: f32[1,128], index: 6, kind: input, shape index: {}]   ;;  %s1131_s7 = inlined_call_operand.hbm [shape: f32[128,128], index: 7, kind: input, shape index: {}]   ;;  %s1132_s8 = inlined_call_operand.vmem [shape: f32[1,128], index: 8, kind: input, shape index: {}]   ;;  %s1133_s9 = inlined_call_operand.hbm [shape: f32[8,128], index: 9, kind: output, shape index: {}]  }
   0x1   :  { %15 = vsyncpa [#allocation6], 0 }
   0x2   :  { %16 = vsyncpa [#allocation9], 0 }
   0x3   :  { %17 = vsyncpa [#allocation4], 0  ;;  %s947_s30 = smov [#allocation5]   ;;  %s807_s13 = scalar_lea.hbm %s1125_s1, 2048 }
   0x4   :  { %s33_s10 = sshll.u32 %s947_s30, 4  ;;  %p808_p0 = scmp.ne.s32.totalorder %s1125_s1, %s807_s13  ;;  %s34_s10 = int_to_ptr.vmem [resolvable:$true] %s33_s10 }
   0x5   :  { %p811_p1 = scmp.lt.u32.totalorder %s807_s13, %s1125_s1 }
   0x7   :  { %p813_p2 = pnand %p811_p1, %p808_p0 }
   0x9   :  { %816 = shalt.err (!%p813_p2)
}
   0xa   :  { %s817_s18 = scalar_lea.vmem %s34_s10, 2048  ;;  %p822_p4 = scmp.lt.s32.totalorder %s34_s10, %s34_s10 }
   0xb   :  { %p818_p3 = scmp.ne.s32.totalorder %s34_s10, %s817_s18  ;;  %p823_p5 = scmp.lt.s32.totalorder %s817_s18, %s817_s18 }
   0xd   :  { %p824_p6 = por %p823_p5, %p822_p4 }
   0xf   :  { %p825_p7 = pnand %p824_p6, %p818_p3 }
  0x11   :  { %828 = shalt.err (!%p825_p7)
}
  0x12   :  { %s948_s19 = smov 128   ;;  %s949_s20 = smov 8  }
  0x13   :  { %39 = dma.hbm_to_vmem [thread:$0]  %s1125_s1, 2048, %s34_s10, [#allocation6], %s948_s19, %s948_s19, %s949_s20  }
  0x14   :  { %s950_s23 = smov [#allocation8]   ;;  %s951_s25 = smov [#allocation2]  }
  0x15   :  { %s61_s24 = sshll.u32 %s950_s23, 4  ;;  %s24_s26 = sshll.u32 %s951_s25, 4  ;;  %s62_s24 = int_to_ptr.vmem [resolvable:$true] %s61_s24  ;;  %s25_s26 = int_to_ptr.vmem [resolvable:$true] %s24_s26 }
  0x16   :  { %s829_s29 = scalar_lea.hbm %s1129_s5, 4096 }
  0x17   :  { %p830_p8 = scmp.ne.s32.totalorder %s1129_s5, %s829_s29  ;;  %p833_p9 = scmp.lt.u32.totalorder %s829_s29, %s1129_s5 }
  0x19   :  { %p835_p10 = pnand %p833_p9, %p830_p8 }
  0x1b   :  { %838 = shalt.err (!%p835_p10)
}
  0x1c   :  { %s839_s1 = scalar_lea.vmem %s62_s24, 4096  ;;  %p844_p12 = scmp.lt.s32.totalorder %s62_s24, %s62_s24 }
  0x1d   :  { %p840_p11 = scmp.ne.s32.totalorder %s62_s24, %s839_s1  ;;  %p845_p13 = scmp.lt.s32.totalorder %s839_s1, %s839_s1 }
  0x1f   :  { %p846_p0 = por %p845_p13, %p844_p12 }
  0x21   :  { %p847_p1 = pnand %p846_p0, %p840_p11 }
  0x23   :  { %850 = shalt.err (!%p847_p1)
}
  0x24   :  { %67 = dma.hbm_to_vmem [thread:$0]  %s1129_s5, 4096, %s62_s24, [#allocation9], %s948_s19, %s948_s19, %s949_s20  }
  0x25   :  { %s851_s17 = scalar_lea.hbm %s1124_s0, 128 }
  0x26   :  { %p852_p2 = scmp.ne.s32.totalorder %s1124_s0, %s851_s17  ;;  %p855_p3 = scmp.lt.u32.totalorder %s851_s17, %s1124_s0 }
  0x28   :  { %p857_p4 = pnand %p855_p3, %p852_p2 }
  0x2a   :  { %860 = shalt.err (!%p857_p4)
}
  0x2b   :  { %s861_s25 = scalar_lea.vmem %s25_s26, 128  ;;  %p866_p6 = scmp.lt.s32.totalorder %s25_s26, %s25_s26 }
  0x2c   :  { %p862_p5 = scmp.ne.s32.totalorder %s25_s26, %s861_s25  ;;  %p867_p7 = scmp.lt.s32.totalorder %s861_s25, %s861_s25 }
  0x2e   :  { %p868_p8 = por %p867_p7, %p866_p6 }
  0x30   :  { %p869_p9 = pnand %p868_p8, %p862_p5 }
  0x32   :  { %872 = shalt.err (!%p869_p9)
}
  0x33   :  { %27 = dma.hbm_to_vmem [thread:$0]  %s1124_s0, 128, %s25_s26, [#allocation3]  }
  0x34   :  { %s952_s27 = smov [#allocation7]   ;;  %s873_s11 = scalar_lea.hbm %s1127_s3, 4096 }
  0x35   :  { %s47_s28 = sshll.u32 %s952_s27, 4  ;;  %p874_p10 = scmp.ne.s32.totalorder %s1127_s3, %s873_s11  ;;  %s48_s28 = int_to_ptr.vmem [resolvable:$true] %s47_s28 }
  0x36   :  { %p877_p11 = scmp.lt.u32.totalorder %s873_s11, %s1127_s3 }
  0x38   :  { %p879_p12 = pnand %p877_p11, %p874_p10 }
  0x3a   :  { %882 = shalt.err (!%p879_p12)
}
  0x3b   :  { %s883_s14 = scalar_lea.vmem %s48_s28, 4096  ;;  %p888_p0 = scmp.lt.s32.totalorder %s48_s28, %s48_s28 }
  0x3c   :  { %p884_p13 = scmp.ne.s32.totalorder %s48_s28, %s883_s14  ;;  %p889_p1 = scmp.lt.s32.totalorder %s883_s14, %s883_s14 }
  0x3e   :  { %p890_p2 = por %p889_p1, %p888_p0 }
  0x40   :  { %p891_p3 = pnand %p890_p2, %p884_p13 }
  0x42   :  { %894 = shalt.err (!%p891_p3)
}
  0x43   :  { %s953_s0 = smov 256   ;;  %s954_s26 = smov 16  }
  0x44   :  { %53 = dma.hbm_to_vmem [thread:$0]  %s1127_s3, 4096, %s48_s28, [#allocation6], %s953_s0, %s953_s0, %s954_s26  }
  0x45   :  { %s955_s17 = smov [#allocation10]   ;;  %s895_s23 = scalar_lea.hbm %s1131_s7, 2048 }
  0x46   :  { %s75_s18 = sshll.u32 %s955_s17, 4  ;;  %p896_p4 = scmp.ne.s32.totalorder %s1131_s7, %s895_s23  ;;  %s76_s18 = int_to_ptr.vmem [resolvable:$true] %s75_s18 }
  0x47   :  { %p899_p5 = scmp.lt.u32.totalorder %s895_s23, %s1131_s7 }
  0x49   :  { %p901_p6 = pnand %p899_p5, %p896_p4 }
  0x4b   :  { %904 = shalt.err (!%p901_p6)
}
  0x4c   :  { %s905_s29 = scalar_lea.vmem %s76_s18, 2048  ;;  %p910_p8 = scmp.lt.s32.totalorder %s76_s18, %s76_s18 }
  0x4d   :  { %p906_p7 = scmp.ne.s32.totalorder %s76_s18, %s905_s29  ;;  %p911_p9 = scmp.lt.s32.totalorder %s905_s29, %s905_s29 }
  0x4f   :  { %p912_p10 = por %p911_p9, %p910_p8 }
  0x51   :  { %p913_p11 = pnand %p912_p10, %p906_p7 }
  0x53   :  { %916 = shalt.err (!%p913_p11)
}
  0x54   :  { %81 = dma.hbm_to_vmem [thread:$0]  %s1131_s7, 2048, %s76_s18, [#allocation9], %s948_s19, %s948_s19, %s949_s20  }
  0x55   :  { %939 = dma.done.wait [#allocation3], 128  }
  0x56   :  { %940 = vsyncadd [#allocation3], 4294967168 }
  0x57   :  { %941 = dma.done.wait [#allocation6], 6144  }
  0x58   :  { %942 = vsyncadd [#allocation6], 4294961152 }
  0x59   :  { %943 = dma.done.wait [#allocation9], 6144  }
  0x5a   :  { %944 = vsyncadd [#allocation9], 4294961152  ;;  %v956_v0 = vmov 0.0|0.0   ;;  %vm957_vm0 = vmmov 0   ;;  %v958_v1 = vmov 0.0   ;;  %v100_v2 = vld [vmem:[#allocation5] sm:$0xff] }
  0x5b   :  { %674 = vmatprep.subr.bf16.mxu0 %v956_v0  ;;  %636 = vmatprep.mubr.msk.f32.mxu0 %vm957_vm0, %v958_v1  ;;  %v101_v3 = vld [vmem:[#allocation5 + $0x8] sm:$0xff]  ;;  %v102_v4 = vld [vmem:[#allocation5 + $0x10] sm:$0xff]  ;;  %v103_v6 = vld [vmem:[#allocation5 + $0x18] sm:$0xff]  ;;  %s959_s13 = smov [#allocation11]  }
  0x5c   :  { %302 = vmatprep.mubr.f32.mxu1 %v958_v1  ;;  %v675_v5 = vpack.c.bf16 %v101_v3, %v100_v2  ;;  %v678_v7 = vpack.c.bf16 %v103_v6, %v102_v4  ;;  %v104_v8 = vld [vmem:[#allocation5 + $0x20] sm:$0xff]  ;;  %v105_v9 = vld [vmem:[#allocation5 + $0x28] sm:$0xff]  ;;  %v106_v11 = vld [vmem:[#allocation5 + $0x30] sm:$0xff]  ;;  %s521_s1 = sshll.u32 %s959_s13, 4  ;;  %s522_s1 = int_to_ptr.vmem [resolvable:$true] %s521_s1 }
  0x5d   :  { %v195_v10 = vld [vmem:[#allocation7 + $0x8] sm:$0xff]  ;;  %v107_v12 = vld [vmem:[#allocation5 + $0x38] sm:$0xff]  ;;  %v194_v14 = vld [vmem:[#allocation7] sm:$0xff]  ;;  %v681_v16 = vpack.c.bf16 %v105_v9, %v104_v8  ;;  %s917_s10 = scalar_lea.vmem %s522_s1, 128  ;;  %p922_p13 = scmp.lt.s32.totalorder %s522_s1, %s522_s1 }
  0x5e   :  { %676 = vmatpush3.bf16.msra.mxu0 %v675_v5  ;;  %v197_v13 = vld [vmem:[#allocation7 + $0x18] sm:$0xff]  ;;  %v196_v15 = vld [vmem:[#allocation7 + $0x10] sm:$0xff]  ;;  %v199_v19 = vld [vmem:[#allocation7 + $0x28] sm:$0xff]  ;;  %v684_v27 = vpack.c.bf16 %v107_v12, %v106_v11  ;;  %p918_p12 = scmp.ne.s32.totalorder %s522_s1, %s917_s10  ;;  %p923_p0 = scmp.lt.s32.totalorder %s917_s10, %s917_s10 }
  0x5f   :  { %677 = vmatprep.subr.bf16.mxu0 %v956_v0  ;;  %v698_v17 = vpack.c.bf16 %v197_v13, %v195_v10  ;;  %v700_v18 = vpack.c.bf16 %v196_v15, %v194_v14  ;;  %v201_v20 = vld [vmem:[#allocation7 + $0x38] sm:$0xff]  ;;  %v198_v21 = vld [vmem:[#allocation7 + $0x20] sm:$0xff]  ;;  %v200_v23 = vld [vmem:[#allocation7 + $0x30] sm:$0xff] }
  0x60   :  { %v702_v22 = vpack.c.bf16 %v201_v20, %v199_v19  ;;  %v203_v24 = vld [vmem:[#allocation7 + $0x48] sm:$0xff]  ;;  %v205_v25 = vld [vmem:[#allocation7 + $0x58] sm:$0xff]  ;;  %v704_v26 = vpack.c.bf16 %v200_v23, %v198_v21  ;;  %v108_v28 = vld [vmem:[#allocation5 + $0x40] sm:$0xff]  ;;  %p924_p1 = por %p923_p0, %p922_p13 }
  0x61   :  { %699 = vmatprep.subr.bf16.mxu1 %v698_v17  ;;  %v706_v29 = vpack.c.bf16 %v205_v25, %v203_v24  ;;  %v202_v30 = vld [vmem:[#allocation7 + $0x40] sm:$0xff]  ;;  %v204_v31 = vld [vmem:[#allocation7 + $0x50] sm:$0xff]  ;;  %v109_v32 = vld [vmem:[#allocation5 + $0x48] sm:$0xff] }
  0x62   :  { %679 = vmatpush3.bf16.msra.mxu0 %v678_v7  ;;  %701 = vmatpush1.bf16.msra.mxu1 %v700_v18  ;;  %v207_v33 = vld [vmem:[#allocation7 + $0x68] sm:$0xff]  ;;  %v209_v34 = vld [vmem:[#allocation7 + $0x78] sm:$0xff]  ;;  %v708_v35 = vpack.c.bf16 %v204_v31, %v202_v30  ;;  %v687_v36 = vpack.c.bf16 %v109_v32, %v108_v28  ;;  %v110_v37 = vld [vmem:[#allocation5 + $0x50] sm:$0xff]  ;;  %p925_p2 = pnand %p924_p1, %p918_p12 }
  0x63   :  { %680 = vmatprep.subr.bf16.mxu0 %v956_v0  ;;  %703 = vmatprep.subr.bf16.mxu1 %v702_v22  ;;  %v710_v38 = vpack.c.bf16 %v209_v34, %v207_v33  ;;  %v206_v39 = vld [vmem:[#allocation7 + $0x60] sm:$0xff]  ;;  %v208_v40 = vld [vmem:[#allocation7 + $0x70] sm:$0xff]  ;;  %v111_v41 = vld [vmem:[#allocation5 + $0x58] sm:$0xff] }
  0x64   :  { %v211_v42 = vld [vmem:[#allocation7 + $0x88] sm:$0xff]  ;;  %v213_v43 = vld [vmem:[#allocation7 + $0x98] sm:$0xff]  ;;  %v712_v44 = vpack.c.bf16 %v208_v40, %v206_v39  ;;  %v690_v45 = vpack.c.bf16 %v111_v41, %v110_v37  ;;  %v210_v47 = vld [vmem:[#allocation7 + $0x80] sm:$0xff] }
  0x65   :  { %v714_v46 = vpack.c.bf16 %v213_v43, %v211_v42  ;;  %v212_v48 = vld [vmem:[#allocation7 + $0x90] sm:$0xff]  ;;  %v112_v49 = vld [vmem:[#allocation5 + $0x60] sm:$0xff]  ;;  %v113_v50 = vld [vmem:[#allocation5 + $0x68] sm:$0xff] }
  0x66   :  { %682 = vmatpush3.bf16.msra.mxu0 %v681_v16  ;;  %705 = vmatpush1.bf16.msra.mxu1 %v704_v26  ;;  %v716_v51 = vpack.c.bf16 %v212_v48, %v210_v47  ;;  %v693_v52 = vpack.c.bf16 %v113_v50, %v112_v49  ;;  %v114_v53 = vld [vmem:[#allocation5 + $0x70] sm:$0xff]  ;;  %v115_v54 = vld [vmem:[#allocation5 + $0x78] sm:$0xff]  ;;  %v215_v57 = vld [vmem:[#allocation7 + $0xa8] sm:$0xff] }
  0x67   :  { %683 = vmatprep.subr.bf16.mxu0 %v956_v0  ;;  %707 = vmatprep.subr.bf16.mxu1 %v706_v29  ;;  %v696_v55 = vpack.c.bf16 %v115_v54, %v114_v53  ;;  %v99_v56 = vld [vmem:[#allocation2] sm:$0xff]  ;;  %v214_v60 = vld [vmem:[#allocation7 + $0xa0] sm:$0xff]  ;;  %v216_v61 = vld [vmem:[#allocation7 + $0xb0] sm:$0xff] }
  0x68   :  { %v217_v58 = vld [vmem:[#allocation7 + $0xb8] sm:$0xff]  ;;  %v720_v62 = vpack.c.bf16 %v216_v61, %v214_v60  ;;  %v219_v63 = vld [vmem:[#allocation7 + $0xc8] sm:$0xff]  ;;  %v218_v3 = vld [vmem:[#allocation7 + $0xc0] sm:$0xff] }
  0x69   :  { %v718_v59 = vpack.c.bf16 %v217_v58, %v215_v57  ;;  %v221_v2 = vld [vmem:[#allocation7 + $0xd8] sm:$0xff]  ;;  %v220_v5 = vld [vmem:[#allocation7 + $0xd0] sm:$0xff]  ;;  %v223_v6 = vld [vmem:[#allocation7 + $0xe8] sm:$0xff] }
  0x6a   :  { %685 = vmatpush3.bf16.msra.mxu0 %v684_v27  ;;  %709 = vmatpush1.bf16.msra.mxu1 %v708_v35  ;;  %v722_v4 = vpack.c.bf16 %v221_v2, %v219_v63  ;;  %v225_v7 = vld [vmem:[#allocation7 + $0xf8] sm:$0xff]  ;;  %v724_v8 = vpack.c.bf16 %v220_v5, %v218_v3  ;;  %v222_v10 = vld [vmem:[#allocation7 + $0xe0] sm:$0xff]  ;;  %v224_v11 = vld [vmem:[#allocation7 + $0xf0] sm:$0xff] }
  0x6b   :  { %686 = vmatprep.subr.bf16.mxu0 %v956_v0  ;;  %711 = vmatprep.subr.bf16.mxu1 %v710_v38  ;;  %v726_v9 = vpack.c.bf16 %v225_v7, %v223_v6  ;;  %v728_v12 = vpack.c.bf16 %v224_v11, %v222_v10  ;;  %v327_v13 = vld [vmem:[#allocation8 + $0x80] sm:$0xff]  ;;  %v328_v14 = vld [vmem:[#allocation8 + $0x88] sm:$0xff]  ;;  %v329_v18 = vld [vmem:[#allocation8 + $0x90] sm:$0xff] }
  0x6c   :  { %v311_v15 = vld [vmem:[#allocation8] sm:$0xff]  ;;  %v730_v16 = vpack.c.bf16 %v328_v14, %v327_v13  ;;  %v312_v17 = vld [vmem:[#allocation8 + $0x8] sm:$0xff]  ;;  %v330_v19 = vld [vmem:[#allocation8 + $0x98] sm:$0xff] }
  0x6d   :  { %v732_v20 = vpack.c.bf16 %v312_v17, %v311_v15  ;;  %v734_v21 = vpack.c.bf16 %v330_v19, %v329_v18  ;;  %v313_v22 = vld [vmem:[#allocation8 + $0x10] sm:$0xff]  ;;  %v314_v23 = vld [vmem:[#allocation8 + $0x18] sm:$0xff]  ;;  %v331_v24 = vld [vmem:[#allocation8 + $0xa0] sm:$0xff]  ;;  %v228_v15 = vlaneseq }
  0x6e   :  { %688 = vmatpush3.bf16.msra.mxu0 %v687_v36  ;;  %713 = vmatpush1.bf16.msra.mxu1 %v712_v44  ;;  %v332_v25 = vld [vmem:[#allocation8 + $0xa8] sm:$0xff]  ;;  %v736_v26 = vpack.c.bf16 %v314_v23, %v313_v22  ;;  %v315_v28 = vld [vmem:[#allocation8 + $0x20] sm:$0xff]  ;;  %v333_v30 = vld [vmem:[#allocation8 + $0xb0] sm:$0xff] }
  0x6f   :  { %689 = vmatprep.subr.bf16.mxu0 %v956_v0  ;;  %715 = vmatprep.subr.bf16.mxu1 %v714_v46  ;;  %v738_v27 = vpack.c.bf16 %v332_v25, %v331_v24  ;;  %v316_v29 = vld [vmem:[#allocation8 + $0x28] sm:$0xff]  ;;  %v334_v31 = vld [vmem:[#allocation8 + $0xb8] sm:$0xff]  ;;  %v317_v34 = vld [vmem:[#allocation8 + $0x30] sm:$0xff] }
  0x70   :  { %v740_v32 = vpack.c.bf16 %v316_v29, %v315_v28  ;;  %v742_v33 = vpack.c.bf16 %v334_v31, %v333_v30  ;;  %v318_v35 = vld [vmem:[#allocation8 + $0x38] sm:$0xff]  ;;  %v335_v42 = vld [vmem:[#allocation8 + $0xc0] sm:$0xff]  ;;  %v336_v43 = vld [vmem:[#allocation8 + $0xc8] sm:$0xff] }
  0x71   :  { %v744_v36 = vpack.c.bf16 %v318_v35, %v317_v34  ;;  %v532_v37 = vld [vmem:[%s1126_s2] ss:$0 sm:$0xff]  ;;  %v746_v44 = vpack.c.bf16 %v336_v43, %v335_v42  ;;  %v320_v46 = vld [vmem:[#allocation8 + $0x48] sm:$0xff]  ;;  %v337_v48 = vld [vmem:[#allocation8 + $0xd0] sm:$0xff] }
  0x72   :  { %691 = vmatpush3.bf16.msra.mxu0 %v690_v45  ;;  %717 = vmatpush1.bf16.msra.mxu1 %v716_v51  ;;  %v319_v45 = vld [vmem:[#allocation8 + $0x40] sm:$0xff]  ;;  %v338_v49 = vld [vmem:[#allocation8 + $0xd8] sm:$0xff]  ;;  %v321_v51 = vld [vmem:[#allocation8 + $0x50] sm:$0xff] }
  0x73   :  { %692 = vmatprep.subr.bf16.mxu0 %v956_v0  ;;  %719 = vmatprep.subr.bf16.mxu1 %v718_v59  ;;  %v748_v47 = vpack.c.bf16 %v320_v46, %v319_v45  ;;  %v750_v50 = vpack.c.bf16 %v338_v49, %v337_v48  ;;  %v339_v54 = vld [vmem:[#allocation8 + $0xe0] sm:$0xff]  ;;  %v324_v57 = vld [vmem:[#allocation8 + $0x68] sm:$0xff]  ;;  %v341_v58 = vld [vmem:[#allocation8 + $0xf0] sm:$0xff] }
  0x74   :  { %v342_v59 = vld [vmem:[#allocation8 + $0xf8] sm:$0xff]  ;;  %v421_v3 = vld [vmem:[#allocation10] sm:$0xff]  ;;  %v423_v5 = vld [vmem:[#allocation10 + $0x10] sm:$0xff] }
  0x75   :  { %v758_v61 = vpack.c.bf16 %v342_v59, %v341_v58  ;;  %v326_v63 = vld [vmem:[#allocation8 + $0x78] sm:$0xff]  ;;  %v426_v10 = vld [vmem:[#allocation10 + $0x28] sm:$0xff]  ;;  %v429_v28 = vld [vmem:[#allocation10 + $0x40] sm:$0xff] }
  0x76   :  { %694 = vmatpush3.bf16.msra.mxu0 %v693_v52  ;;  %721 = vmatpush1.bf16.msra.mxu1 %v720_v62  ;;  %v322_v52 = vld [vmem:[#allocation8 + $0x58] sm:$0xff]  ;;  %v325_v62 = vld [vmem:[#allocation8 + $0x70] sm:$0xff]  ;;  %v430_v29 = vld [vmem:[#allocation10 + $0x48] sm:$0xff] }
  0x77   :  { %695 = vmatprep.subr.bf16.mxu0 %v956_v0  ;;  %723 = vmatprep.subr.bf16.mxu1 %v722_v4  ;;  %v752_v53 = vpack.c.bf16 %v322_v52, %v321_v51  ;;  %v760_v2 = vpack.c.bf16 %v326_v63, %v325_v62  ;;  %v422_v4 = vld [vmem:[#allocation10 + $0x8] sm:$0xff]  ;;  %v424_v7 = vld [vmem:[#allocation10 + $0x18] sm:$0xff]  ;;  %v775_v30 = vpack.c.bf16 %v430_v29, %v429_v28  ;;  %v431_v31 = vld [vmem:[#allocation10 + $0x50] sm:$0xff] }
  0x78   :  { %v763_v6 = vpack.c.bf16 %v422_v4, %v421_v3  ;;  %v428_v13 = vld [vmem:[#allocation10 + $0x38] sm:$0xff]  ;;  %v433_v34 = vld [vmem:[#allocation10 + $0x60] sm:$0xff]  ;;  %v434_v35 = vld [vmem:[#allocation10 + $0x68] sm:$0xff] }
  0x79   :  { %v226_v18 = vld [vmem:[%s1128_s4] sm:$0x3] }
  0x7a   :  { %697 = vmatpush3.bf16.msra.mxu0 %v696_v55  ;;  %725 = vmatpush1.bf16.msra.mxu1 %v724_v8  ;;  %v340_v55 = vld [vmem:[#allocation8 + $0xe8] sm:$0xff]  ;;  %v766_v8 = vpack.c.bf16 %v424_v7, %v423_v5  ;;  %v534_v46 = vld [vmem:[%s1132_s8] ss:$0 sm:$0xff] }
  0x7b   :  { %727 = vmatprep.subr.bf16.mxu1 %v726_v9  ;;  %731 = vmatprep.subr.bf16.mxu0 %v730_v16  ;;  %v425_v9 = vld [vmem:[#allocation10 + $0x20] sm:$0xff]  ;;  %v229_v16 = vshrl.u32 %v228_v15, 7 }
  0x7c   :  { %v769_v11 = vpack.c.bf16 %v426_v10, %v425_v9 }
  0x7d   :  { %637 = vmatmul.mubr.f32.vlgmr.msra.gmra.mrb[0].mxu0 %v99_v56  ;;  %v323_v56 = vld [vmem:[#allocation8 + $0x60] sm:$0xff]  ;;  %v230_v17 = vsub.s32 0, %v229_v16  ;;  %v234_v19 = vsub.s32 1, %v229_v16 }
  0x7e   :  { %729 = vmatpush1.bf16.msra.mxu1 %v728_v12  ;;  %733 = vmatpush3.bf16.msra.mxu0 %v732_v20  ;;  %v756_v60 = vpack.c.bf16 %v324_v57, %v323_v56  ;;  %v427_v12 = vld [vmem:[#allocation10 + $0x30] sm:$0xff] }
  0x7f   :  { %762 = vmatprep.subr.bf16.mxu1 %v956_v0  ;;  %735 = vmatprep.subr.bf16.mxu0 %v734_v21  ;;  %v772_v14 = vpack.c.bf16 %v428_v13, %v427_v12  ;;  %v231_v20 = vrot.slane %v226_v18, %v230_v17  ;;  %v235_v21 = vrot.slane %v226_v18, %v234_v19 }
  0x82   :  { %737 = vmatpush3.bf16.msra.mxu0 %v736_v26 }
  0x83   :  { %739 = vmatprep.subr.bf16.mxu0 %v738_v27 }
  0x86   :  { %741 = vmatpush3.bf16.msra.mxu0 %v740_v32  ;;  %v432_v32 = vld [vmem:[#allocation10 + $0x58] sm:$0xff] }
  0x87   :  { %743 = vmatprep.subr.bf16.mxu0 %v742_v33  ;;  %v778_v33 = vpack.c.bf16 %v432_v32, %v431_v31 }
  0x8a   :  { %745 = vmatpush3.bf16.msra.mxu0 %v744_v36  ;;  %v781_v36 = vpack.c.bf16 %v434_v35, %v433_v34 }
  0x8b   :  { %747 = vmatprep.subr.bf16.mxu0 %v746_v44 }
  0x8e   :  { %749 = vmatpush3.bf16.msra.mxu0 %v748_v47 }
  0x8f   :  { %751 = vmatprep.subr.bf16.mxu0 %v750_v50 }
  0x92   :  { %753 = vmatpush3.bf16.msra.mxu0 %v752_v53 }
 0x150   :  { %v189_v38 = vpop.f32.mrb[0].mxu0 }
 0x151   :  { %v190_v39 = vadd.f32 %v532_v37, %v189_v38  ;;  %v638_v40 = vpop.f32.mrb[1].mxu0  ;;  %v435_v37 = vld [vmem:[#allocation10 + $0x70] sm:$0xff]  ;;  %v436_v38 = vld [vmem:[#allocation10 + $0x78] sm:$0xff] }
 0x153   :  { %799 = vtanh.f32 %v190_v39  ;;  %v784_v39 = vpack.c.bf16 %v436_v38, %v435_v37 }
 0x15d   :  { %v800_v41 = vpop.eup %799 }
 0x15e   :  { %303 = vmatmul.mubr.f32.vlgmr.msra.gmra.mrb[0].mxu1 %v800_v41  ;;  %v533_v41 = vld [vmem:[%s1130_s6] ss:$0 sm:$0xff] }
 0x15f   :  { %671 = vmatprep.mubr.msk.f32.mxu1 %vm957_vm0, %v958_v1  ;;  %v754_v1 = vpack.c.bf16 %v340_v55, %v339_v54  ;;  %764 = vmatpush3.bf16.msra.mxu1 %v763_v6 }
 0x160   :  { %765 = vmatprep.subr.bf16.mxu1 %v956_v0 }
 0x161   :  { %755 = vmatprep.subr.bf16.mxu0 %v754_v1 }
 0x162   :  { %757 = vmatpush3.bf16.msra.mxu0 %v756_v60 }
 0x163   :  { %759 = vmatprep.subr.bf16.mxu0 %v758_v61  ;;  %767 = vmatpush3.bf16.msra.mxu1 %v766_v8 }
 0x164   :  { %768 = vmatprep.subr.bf16.mxu1 %v956_v0 }
 0x166   :  { %761 = vmatpush3.bf16.msra.mxu0 %v760_v2 }
 0x167   :  { %770 = vmatpush3.bf16.msra.mxu1 %v769_v11 }
 0x168   :  { %771 = vmatprep.subr.bf16.mxu1 %v956_v0 }
 0x16b   :  { %773 = vmatpush3.bf16.msra.mxu1 %v772_v14 }
 0x16c   :  { %774 = vmatprep.subr.bf16.mxu1 %v956_v0 }
 0x16f   :  { %776 = vmatpush3.bf16.msra.mxu1 %v775_v30 }
 0x170   :  { %777 = vmatprep.subr.bf16.mxu1 %v956_v0 }
 0x173   :  { %779 = vmatpush3.bf16.msra.mxu1 %v778_v33 }
 0x174   :  { %780 = vmatprep.subr.bf16.mxu1 %v956_v0 }
 0x177   :  { %782 = vmatpush3.bf16.msra.mxu1 %v781_v36 }
 0x178   :  { %783 = vmatprep.subr.bf16.mxu1 %v956_v0 }
 0x17b   :  { %785 = vmatpush3.bf16.msra.mxu1 %v784_v39 }
 0x231   :  { %v304_v22 = vpop.f32.mrb[0].mxu1 }
 0x232   :  { %v305_v23 = vadd.f32 %v304_v22, %v231_v20  ;;  %v306_v24 = vpop.f32.mrb[1].mxu1 }
 0x233   :  { %v307_v25 = vadd.f32 %v306_v24, %v235_v21 }
 0x235   :  { %801 = vtanh.f32 %v307_v25 }
 0x236   :  { %803 = vtanh.f32 %v305_v23 }
 0x23f   :  { %v802_v26 = vpop.eup %801 }
 0x240   :  { %v804_v27 = vpop.eup %803  ;;  %414 = vmatprep.mubr.f32.mxu0 %v802_v26 }
 0x241   :  { %415 = vmatmul.mubr.f32.vlgmr.msra.gmra.mrb[2].mxu0 %v804_v27 }
 0x314   :  { %v584_v40 = vpop.f32.mrb[2].mxu0 }
 0x315   :  { %v585_v42 = vpop.f32.mrb[3].mxu0 }
 0x316   :  { %v586_v43 = vadd.f32 %v585_v42, %v584_v40 }
 0x318   :  { %v417_v44 = vadd.f32 %v586_v43, %v533_v41 }
 0x31a   :  { %805 = vtanh.f32 %v417_v44 }
 0x324   :  { %v806_v45 = vpop.eup %805 }
 0x325   :  { %672 = vmatmul.mubr.f32.vlgmr.msra.gmra.mrb[2].mxu1 %v806_v45 }
 0x3f8   :  { %v510_v47 = vpop.f32.mrb[2].mxu1 }
 0x3f9   :  { %v511_v0 = vadd.f32 %v534_v46, %v510_v47  ;;  %v673_v48 = vpop.f32.mrb[3].mxu1 }
 0x3fb   :  { %514 = vst [vmem:[#allocation11] sm:$0xff] %v511_v0 }
 0x3fc   :  { %928 = shalt.err (!%p925_p2)
}
 0x3fd   :  { %s929_s0 = scalar_lea.hbm %s1133_s9, 128 }
 0x3fe   :  { %p930_p3 = scmp.ne.s32.totalorder %s1133_s9, %s929_s0  ;;  %p933_p4 = scmp.lt.u32.totalorder %s929_s0, %s1133_s9 }
 0x400   :  { %p935_p5 = pnand %p933_p4, %p930_p3 }
 0x402   :  { %938 = shalt.err (!%p935_p5)
}
 0x403   :  { %524 = dma.vmem_to_hbm [thread:$0]  %s522_s1, 128, %s1133_s9, [#allocation4]  }
 0x404   :  { %945 = dma.done.wait [#allocation4], 128  }
 0x405   :  { %946 = vsyncadd [#allocation4], 4294967168 }
 0x406   :  { %528 = vsyncpa [#allocation3], 1 }
 0x407   :  { %529 = vsyncpa [#allocation6], 1 }
 0x408   :  { %530 = vsyncpa [#allocation9], 1 }
 0x409   :  { %531 = vsyncpa [#allocation4], 1 }

</bundles_post_ra>
